<compile_context>
chip_gen: v6e
topology: v6e:2x2x1
jax: 0.10.0
libtpu: 0.0.40
codegen_flags: <defaults>
</compile_context>

<pallas_src>
import jax
import jax.numpy as jnp
from jax.experimental import pallas as pl
from jax.experimental.pallas import tpu as pltpu

_MIB = 1024 * 1024


def _fbn_kernel(x_ref, s_ref, b_ref, o_ref):
    # x_ref / o_ref: (Nb, Cb, Hb, W) activation tile.
    # s_ref / b_ref: (1, Cb, 1, 1) float32 per-channel scale / bias,
    # broadcast over (Nb, Hb, W) by the VPU (cheap; op is HBM-bound anyway).
    x = x_ref[...].astype(jnp.float32)
    o_ref[...] = (x * s_ref[...] + b_ref[...]).astype(o_ref.dtype)


def _device_tuning():
    """(target input-tile bytes, vmem_limit_bytes) per TPU generation."""
    try:
        kind = jax.devices()[0].device_kind.lower()
    except Exception:
        kind = ""
    if "v5 lite" in kind or "v5e" in kind:
        # 16 MiB scoped-VMEM default, 128 MiB physical: keep tiles modest but
        # raise the scoped limit explicitly so double-buffering never forces
        # single-buffering.
        return 3 * _MIB, 32 * _MIB
    if "v6" in kind:
        return 6 * _MIB, 64 * _MIB      # 128 MiB physical VMEM
    if "7" in kind:
        return 6 * _MIB, 48 * _MIB      # v7x: 64 MiB physical VMEM, 2 TCs
    return 4 * _MIB, 48 * _MIB          # safe default everywhere


def _round_down(x, m):
    return max(m, (x // m) * m)


def _choose_tiles(N, C, H, W, itemsize, target_bytes, min_blocks=4):
    """Pick (Nb, Cb, Hb) for blocks of shape (Nb, Cb, Hb, W).

    The trailing dims are always (full or 8-aligned H, full W), so the (8,128)
    block constraint is satisfied without ever touching the HBM layout.
    """
    sub = 32 // itemsize            # min sublane multiple: 8 f32, 16 bf16, 32 i8
    hw_bytes = H * W * itemsize     # one channel slab
    max_cb = 256                    # caps padded (1,Cb,1,1) param VMEM (~4 MiB)

    if hw_bytes > target_bytes and H > sub:
        # A single channel slab exceeds the budget: split H (8-aligned blocks,
        # ragged tail masked by Pallas).
        Nb, Cb = 1, 1
        Hb = min(H, _round_down(target_bytes // (W * itemsize), sub))
    else:
        Hb = H
        Cb = max(1, min(C, target_bytes // max(hw_bytes, 1), max_cb))
        Nb = max(1, min(N, target_bytes // max(Cb * hw_bytes, 1)))

    # Guarantee enough grid blocks so both v7x TensorCores get work (a few
    # extra 0.35 us grid steps are negligible; a (1,1,1) grid halves usable
    # HBM bandwidth on v7x).
    def nblocks(nb, cb, hb):
        return pl.cdiv(N, nb) * pl.cdiv(C, cb) * pl.cdiv(H, hb)

    while nblocks(Nb, Cb, Hb) < min_blocks:
        if Cb > 1:
            Cb = pl.cdiv(Cb, 2)
        elif Nb > 1:
            Nb = pl.cdiv(Nb, 2)
        elif Hb == H and H > sub:
            Hb = _round_down(pl.cdiv(H, 2), sub)
        elif Hb > sub:
            new_hb = _round_down(pl.cdiv(Hb, 2), sub)
            if new_hb == Hb:
                break
            Hb = new_hb
        else:
            break
    return Nb, Cb, Hb


def frozen_bn_params(weight, bias, running_mean, running_var, eps=0.0):
    """Fold frozen statistics into per-channel (1, C, 1, 1) f32 scale/bias.

    These depend only on the frozen buffers; in inference graphs with many
    FrozenBN layers compute them once and reuse with `apply_frozen_bn`.
    """
    w = weight.astype(jnp.float32)
    v = running_var.astype(jnp.float32)
    m = running_mean.astype(jnp.float32)
    b = bias.astype(jnp.float32)
    scale = w * jax.lax.rsqrt(v + eps)          # eps=0.0 matches the spec module
    bias_eff = b - m * scale
    C = scale.shape[0]
    return scale.reshape(1, C, 1, 1), bias_eff.reshape(1, C, 1, 1)


def apply_frozen_bn(x, scale4, bias4, *, target_tile_bytes=None):
    """y = x * scale + bias on an NCHW activation, per channel."""
    N, C, H, W = x.shape
    itemsize = jnp.dtype(x.dtype).itemsize
    tgt, vmem_limit = _device_tuning()
    if target_tile_bytes is not None:
        tgt = target_tile_bytes
    Nb, Cb, Hb = _choose_tiles(N, C, H, W, itemsize, tgt)
    grid = (pl.cdiv(N, Nb), pl.cdiv(C, Cb), pl.cdiv(H, Hb))

    cost = pl.CostEstimate(
        flops=2 * N * C * H * W,
        transcendentals=0,
        bytes_accessed=2 * N * C * H * W * itemsize + 2 * C * 4,
    )

    return pl.pallas_call(
        _fbn_kernel,
        out_shape=jax.ShapeDtypeStruct((N, C, H, W), x.dtype),
        grid=grid,
        in_specs=[
            # Activation tile: trailing dims are (full-or-8-aligned H, full W),
            # so no reshape / relayout of x is ever needed.
            pl.BlockSpec((Nb, Cb, Hb, W), lambda n, c, h: (n, c, h, 0)),
            # Param tiles: block index invariant along n and the inner h axis,
            # so they are not re-DMA'd every grid step.
            pl.BlockSpec((1, Cb, 1, 1), lambda n, c, h: (0, c, 0, 0)),
            pl.BlockSpec((1, Cb, 1, 1), lambda n, c, h: (0, c, 0, 0)),
        ],
        out_specs=pl.BlockSpec((Nb, Cb, Hb, W), lambda n, c, h: (n, c, h, 0)),
        compiler_params=pltpu.CompilerParams(
            dimension_semantics=("parallel", "parallel", "parallel"),
            vmem_limit_bytes=vmem_limit,
        ),
        cost_estimate=cost,
    )(x, scale4, bias4)


def frozen_batch_norm_2d(x, weight, bias, running_mean, running_var, eps=0.0,
                         **kwargs):
    """Exact FrozenBatchNorm2d forward for NCHW input (convenience wrapper)."""
    scale4, bias4 = frozen_bn_params(weight, bias, running_mean, running_var, eps)
    return apply_frozen_bn(x, scale4, bias4, **kwargs)


def _reference(x, weight, bias, running_mean, running_var, eps=0.0):
    scale = weight.astype(jnp.float32) * jax.lax.rsqrt(
        running_var.astype(jnp.float32) + eps)
    b_eff = bias.astype(jnp.float32) - running_mean.astype(jnp.float32) * scale
    y = x.astype(jnp.float32) * scale.reshape(1, -1, 1, 1) + b_eff.reshape(1, -1, 1, 1)
    return y.astype(x.dtype)


if __name__ == "__main__":
    key = jax.random.PRNGKey(0)

    def make_params(C):
        weight = jnp.linspace(0.5, 1.5, C, dtype=jnp.float32)
        bias = jnp.linspace(-0.25, 0.25, C, dtype=jnp.float32)
        running_mean = jnp.linspace(-0.1, 0.1, C, dtype=jnp.float32)
        running_var = jnp.linspace(0.8, 1.2, C, dtype=jnp.float32)
        return weight, bias, running_mean, running_var

    k1, k2, k3 = jax.random.split(key, 3)

    # Case 1: canonical small NCHW shape, f32.
    N, C, H, W = 2, 4, 16, 16
    x = jax.random.normal(k1, (N, C, H, W), dtype=jnp.float32)
    w, b, rm, rv = make_params(C)
    y = jax.block_until_ready(frozen_batch_norm_2d(x, w, b, rm, rv))
    y_ref = _reference(x, w, b, rm, rv)
    assert y.shape == x.shape and y.dtype == x.dtype
    assert jnp.allclose(y, y_ref, rtol=1e-6, atol=1e-6)

    # Case 2: H not a multiple of 8, non-128 W; tiny tile target forces the
    # H-splitting path with a ragged (masked) tail — still no reshape of x.
    N, C, H, W = 1, 3, 36, 160
    x = jax.random.normal(k2, (N, C, H, W), dtype=jnp.float32)
    w, b, rm, rv = make_params(C)
    y = jax.block_until_ready(
        frozen_batch_norm_2d(x, w, b, rm, rv, target_tile_bytes=8 * 1024))
    y_ref = _reference(x, w, b, rm, rv)
    assert jnp.allclose(y, y_ref, rtol=1e-6, atol=1e-6)

    # Case 3: bf16 input (f32 scale math, narrow store).
    N, C, H, W = 2, 4, 16, 16
    x = jax.random.normal(k3, (N, C, H, W), dtype=jnp.float32).astype(jnp.bfloat16)
    w, b, rm, rv = make_params(C)
    y = jax.block_until_ready(frozen_batch_norm_2d(x, w, b, rm, rv))
    y_ref = _reference(x, w, b, rm, rv)
    assert y.dtype == jnp.bfloat16
    assert jnp.allclose(y.astype(jnp.float32), y_ref.astype(jnp.float32),
                        rtol=2e-2, atol=2e-2)

    print("KERNEL_OK")
</pallas_src>

<mosaic_0001>
module attributes {stable_mosaic.version = 11 : i64} {
  func.func @_fbn_kernel(%arg0: i32, %arg1: i32, %arg2: i32, %arg3: memref<2x1x16x16xf32, #tpu.memory_space<vmem>>, %arg4: memref<1x1x1x1xf32, #tpu.memory_space<vmem>>, %arg5: memref<1x1x1x1xf32, #tpu.memory_space<vmem>>, %arg6: memref<2x1x16x16xf32, #tpu.memory_space<vmem>>) attributes {dimension_semantics = [#tpu.dimension_semantics<parallel>, #tpu.dimension_semantics<parallel>, #tpu.dimension_semantics<parallel>], iteration_bounds = array<i64: 1, 4, 1>, scalar_prefetch = 0 : i64, scratch_operands = 0 : i64, tpu.core_type = #tpu.core_type<tc>, window_params = [{transform_indices = @transform_0, window_bounds = array<i64: 2, 1, 16, 16>}, {transform_indices = @transform_1, window_bounds = array<i64: 1, 1, 1, 1>}, {transform_indices = @transform_2, window_bounds = array<i64: 1, 1, 1, 1>}, {transform_indices = @transform_3, window_bounds = array<i64: 2, 1, 16, 16>}]} {
    %c0 = arith.constant 0 : index
    %c0_0 = arith.constant 0 : index
    %c0_1 = arith.constant 0 : index
    %c0_2 = arith.constant 0 : index
    %0 = vector.load %arg3[%c0, %c0_0, %c0_1, %c0_2] : memref<2x1x16x16xf32, #tpu.memory_space<vmem>>, vector<2x1x16x16xf32>
    %c0_3 = arith.constant 0 : index
    %c0_4 = arith.constant 0 : index
    %c0_5 = arith.constant 0 : index
    %c0_6 = arith.constant 0 : index
    %1 = vector.load %arg4[%c0_3, %c0_4, %c0_5, %c0_6] : memref<1x1x1x1xf32, #tpu.memory_space<vmem>>, vector<1x1x1x1xf32>
    %2 = vector.broadcast %1 : vector<1x1x1x1xf32> to vector<2x1x16x16xf32>
    %3 = arith.mulf %0, %2 : vector<2x1x16x16xf32>
    %c0_7 = arith.constant 0 : index
    %c0_8 = arith.constant 0 : index
    %c0_9 = arith.constant 0 : index
    %c0_10 = arith.constant 0 : index
    %4 = vector.load %arg5[%c0_7, %c0_8, %c0_9, %c0_10] : memref<1x1x1x1xf32, #tpu.memory_space<vmem>>, vector<1x1x1x1xf32>
    %5 = vector.broadcast %4 : vector<1x1x1x1xf32> to vector<2x1x16x16xf32>
    %6 = arith.addf %3, %5 : vector<2x1x16x16xf32>
    %c0_11 = arith.constant 0 : index
    %c0_12 = arith.constant 0 : index
    %c0_13 = arith.constant 0 : index
    %c0_14 = arith.constant 0 : index
    %7 = vector.load %arg6[%c0_11, %c0_12, %c0_13, %c0_14] : memref<2x1x16x16xf32, #tpu.memory_space<vmem>>, vector<2x1x16x16xf32>
    tpu.vector_store %arg6[%c0_11, %c0_12, %c0_13, %c0_14], %6 {strides = array<i32>} : memref<2x1x16x16xf32, #tpu.memory_space<vmem>>, vector<2x1x16x16xf32>,
    return
  }
  func.func @transform_0(%arg0: i32, %arg1: i32, %arg2: i32) -> (i32, i32, i32, i32) {
    %c0_i32 = arith.constant 0 : i32
    %c0_i32_0 = arith.constant 0 : i32
    return %arg0, %arg1, %arg2, %c0_i32 : i32, i32, i32, i32
  }
  func.func @transform_1(%arg0: i32, %arg1: i32, %arg2: i32) -> (i32, i32, i32, i32) {
    %c0_i32 = arith.constant 0 : i32
    %c0_i32_0 = arith.constant 0 : i32
    %c0_i32_1 = arith.constant 0 : i32
    %c0_i32_2 = arith.constant 0 : i32
    return %c0_i32, %arg1, %c0_i32_0, %c0_i32_1 : i32, i32, i32, i32
  }
  func.func @transform_2(%arg0: i32, %arg1: i32, %arg2: i32) -> (i32, i32, i32, i32) {
    %c0_i32 = arith.constant 0 : i32
    %c0_i32_0 = arith.constant 0 : i32
    %c0_i32_1 = arith.constant 0 : i32
    %c0_i32_2 = arith.constant 0 : i32
    return %c0_i32, %arg1, %c0_i32_0, %c0_i32_1 : i32, i32, i32, i32
  }
  func.func @transform_3(%arg0: i32, %arg1: i32, %arg2: i32) -> (i32, i32, i32, i32) {
    %c0_i32 = arith.constant 0 : i32
    %c0_i32_0 = arith.constant 0 : i32
    return %arg0, %arg1, %arg2, %c0_i32 : i32, i32, i32, i32
  }
}

</mosaic_0001>

<bundles_post_ra>
// kernel: tpu_custom_call.1
= control target key start
LH: loop header
LB: loop body
LE: loop exit
PB: predicated region body
PF: predicated region fallthrough
CT: control target
= control target key end

     0   :  { %8 = vsyncpa [#allocation3], 0  ;;  %s809_s0 = inlined_call_operand.hbm [shape: f32[2,4,16,16], index: 0, kind: input, shape index: {}]   ;;  %s810_s1 = inlined_call_operand.vmem [shape: f32[1,4,1,1], index: 1, kind: input, shape index: {}]   ;;  %s811_s2 = inlined_call_operand.vmem [shape: f32[1,4,1,1], index: 2, kind: input, shape index: {}]   ;;  %s812_s3 = inlined_call_operand.hbm [shape: f32[2,4,16,16], index: 3, kind: output, shape index: {}]  }
   0x1   :  { %10 = vsyncpa [#allocation3 + $0x1], 0 }
   0x2   :  { %11 = vsyncpa [#allocation4], 0 }
   0x3   :  { %13 = vsyncpa [#allocation4 + $0x1], 0  ;;  %s665_s12 = smov 0   ;;  %s667_s13 = smov 0  }
   0x4   :  { %s669_s14 = smov 0   ;;  %s671_s15 = smov 0  }
   0x5   :  { %s673_s16 = smov 0   ;;  %s675_s17 = smov 0  }
   0x6 LB: > { %s469_s18 = sadd.s32 4294967295, %s629_s17   ;;  %s470_s19 = sadd.s32 4294967294, %s629_s17   ;;  %s629_s17 = sphi %s675_s17, %s19_s17   ;;  %s625_s16 = sphi %s673_s16, %s821_s16   ;;  %s621_s15 = sphi %s671_s15, %s820_s15   ;;  %s617_s14 = sphi %s669_s14, %s819_s14   ;;  %s613_s13 = sphi %s667_s13, %s818_s13   ;;  %s609_s12 = sphi %s665_s12, %s817_s12  }
   0x7   : > { %s34_s20 = sadd.s32 1, %s625_s16  ;;  %s49_s21 = sadd.s32 1, %s617_s14 }
   0x8   : > { %p36_p0 = scmp.ge.s32.totalorder %s34_s20, 4  ;;  %p56_p1 = scmp.ne.s32.totalorder %s617_s14, %s613_s13 }
   0x9   : > { %p57_p2 = scmp.eq.s32.totalorder %s629_s17, 0  ;;  %p62_p3 = scmp.ne.s32.totalorder %s613_s13, %s609_s12 }
   0xa   : > { %s823_s20 = smov (%p36_p0, %s34_s20), 0  ;;  %p63_p5 = scmp.eq.s32.totalorder %s469_s18, 0 }
   0xb   : > { %p706_p4 = por %p57_p2, %p56_p1  ;;  %s43_s23 = ssub.s32 %s625_s16, %s823_s20 }
   0xc   : > { %p142_p6 = scmp.eq.s32.totalorder %s469_s18, 3  ;;  %p47_p7 = scmp.eq.s32.totalorder %s43_s23, 0 }
   0xd   : > { %p712_p8 = por %p63_p5, %p62_p3  ;;  %p148_p10 = scmp.eq.s32.totalorder %s470_s19, 3 }
   0xe   : > { %p716_p9 = por %p142_p6, %p56_p1  ;;  %p472_p12 = scmp.ge.s32.totalorder %s629_s17, 4 }
   0xf   : > { %s721_s26 = scalar_select %p47_p7, %s617_s14, %s49_s21  }
  0x10   : > { %p723_p11 = por %p148_p10, %p62_p3  ;;  %164 = sbr.rel (%p472_p12) target bundleno = 34 (0x22), region = 16 }
  0x15   : > { %s168_s28 = sand.u32 1, %s617_s14   ;;  %s488_s29 = sshll.u32 %s625_s16, 8 }
  0x16   : > { %s473_s30 = sshll.u32 %s168_s28, 5  ;;  %s183_s6 = scalar_lea.hbm %s809_s0, %s488_s29 }
  0x17   : > { %s490_s7 = scalar_select %p706_p4, [#allocation0], [#allocation10] }
  0x18   : > { %s172_s8 = scalar_lea.vmem [#allocation2], %s473_s30  ;;  %s631_s11 = smov 1024  }
  0x19   : > { %s196_s9 = sshll.u32 %s172_s8, 4  ;;  %s188_s10 = sld [smem:[%s490_s7]]   ;;  %s197_s9 = int_to_ptr.vmem [resolvable:$true] %s196_s9 }
  0x1a   : > { %491 = sst [smem:[#allocation7]] (%p706_p4), %s631_s11  ;;  %s632_s18 = smov 256  }
  0x1b   : > { %492 = sst [smem:[#allocation7 + $0x1]] (%p706_p4), %s632_s18  ;;  %s633_s19 = smov 2  }
  0x1c   : > { %493 = sst [smem:[#allocation7 + $0x2]] (%p706_p4), %s633_s19  ;;  %s634_s21 = smov 128  }
  0x1d   : > { %494 = sst [smem:[#allocation7 + $0x3]] (%p706_p4), %s634_s21  ;;  %s635_s29 = smov 8  }
  0x1e   : > { %495 = sst [smem:[#allocation7 + $0x4]] (%p706_p4), %s634_s21  ;;  %s169_s4 = scalar_lea.sflag [#allocation3], %s168_s28 }
  0x1f   : > { %s476_s23 = sshll.u32 %s188_s10, 26  ;;  %496 = sst [smem:[#allocation7 + $0x5]] (%p706_p4), %s635_s29 }
  0x20   : > { %s477_s30 = sadd.s32 134217728, %s476_s23  ;;  %s636_s5 = smov 131072  }
  0x21   : > { %497 = dma.general (%p706_p4), %s183_s6, 512, %s197_s9, %s169_s4, %s636_s5, [#allocation7], %s477_s30, 0  }
  0x22 PF: > { %p478_p13 = scmp.ge.s32.totalorder %s629_s17, 1  ;;  %p229_p0 = scmp.lt.s32.totalorder %s629_s17, 5 }
  0x24   : > { %p230_p1 = pnand %p478_p13, %p229_p0 }
  0x25   : > { %s752_s7 = sand.u32 (!%p230_p1), 1, %s613_s13  }
  0x26   : > { %233 = sbr.rel (%p230_p1) target bundleno = 191 (0xbf), region = 32  ;;  %s479_s8 = sshll.u32 (!%p230_p1), %s752_s7, 5 }
  0x27   : > { %s236_s10 = scalar_lea.sflag (!%p230_p1), [#allocation3], %s752_s7  ;;  %s239_s11 = scalar_lea.vmem (!%p230_p1), [#allocation2], %s479_s8 }
  0x2b   : > { %600 = dma.done.wait (%p712_p8), %s236_s10, 512  }
  0x2c   : > { %602 = vsyncadd (%p712_p8), %s236_s10, 4294966784  ;;  %p270_p2 = scmp.lt.s32.totalorder %s621_s15, 3  ;;  %v637_v0 = vmov 0   ;;  %v278_v3 = vld [vmem:[%s239_s11] sm:$0xff]  ;;  %v279_v5 = vld [vmem:[%s239_s11 + $0x8] sm:$0xff]  ;;  %vm310_vm0 = vcmask 130048  }
  0x2d   : > { %574 = vset.pattern.permute.xlu0 %v637_v0  ;;  %v280_v6 = vld [vmem:[%s239_s11 + $0x10] sm:$0xff]  ;;  %v281_v7 = vld [vmem:[%s239_s11 + $0x18] sm:$0xff]  ;;  %s267_s24 = scalar_lea.vmem [#allocation5], %s479_s8  ;;  %s316_s23 = scalar_lea.sflag [#allocation4], %s752_s7 }
  0x2e   : > { %s271_s22 = scalar_select %p270_p2, %s621_s15, 3 }
  0x30   : > { %s272_s9 = scalar_lea.vmem %s810_s1, %s271_s22  ;;  %s275_s21 = scalar_lea.vmem %s811_s2, %s271_s22 }
  0x31   : > { %v481_v1 = vld [vmem:[%s272_s9] ss:$0 sm:$0xff] }
  0x32   : > { %289 = vperm.xlu0 %574, %v481_v1   ;;  %v482_v2 = vld [vmem:[%s275_s21] ss:$0 sm:$0xff] }
  0x36   : > { %303 = vperm.xlu0 %574, %v482_v2  }
  0xad   : > { %v290_v4 = vpop.permute.xlu0 %289 }
  0xae   : > { %v292_v8 = vmul.f32 %v290_v4, %v278_v3  ;;  %v293_v9 = vmul.f32 %v290_v4, %v279_v5  ;;  %v294_v10 = vmul.f32 %v290_v4, %v280_v6  ;;  %v295_v11 = vmul.f32 %v290_v4, %v281_v7 }
  0xb1   : > { %v304_v12 = vpop.permute.xlu0 %303 }
  0xb2   : > { %v306_v13 = vadd.f32 %v304_v12, %v292_v8  ;;  %v307_v14 = vadd.f32 %v304_v12, %v293_v9  ;;  %v308_v15 = vadd.f32 %v304_v12, %v294_v10  ;;  %v309_v16 = vadd.f32 %v304_v12, %v295_v11 }
  0xb4   : > { %311 = vst.msk [vmem:[%s267_s24] sm:$0xff] %vm310_vm0, %v306_v13  ;;  %312 = vst.msk [vmem:[%s267_s24 + $0x8] sm:$0xff] %vm310_vm0, %v307_v14 }
  0xb5   : > { %313 = vst.msk [vmem:[%s267_s24 + $0x10] sm:$0xff] %vm310_vm0, %v308_v15  ;;  %314 = vst.msk [vmem:[%s267_s24 + $0x18] sm:$0xff] %vm310_vm0, %v309_v16 }
  0xb6   : > { %s489_s29 = sshll.u32 %s621_s15, 8  ;;  %s344_s30 = sshll.u32 %s267_s24, 4  ;;  %s345_s30 = int_to_ptr.vmem [resolvable:$true] %s344_s30 }
  0xb7   : > { %s333_s10 = scalar_lea.hbm %s812_s3, %s489_s29  ;;  %s638_s8 = smov 256  }
  0xb8   : > { %499 = sst [smem:[#allocation9]] (%p716_p9), %s638_s8  ;;  %s639_s11 = smov 1024  }
  0xb9   : > { %500 = sst [smem:[#allocation9 + $0x1]] (%p716_p9), %s639_s11  ;;  %s640_s7 = smov 2  }
  0xba   : > { %501 = sst [smem:[#allocation9 + $0x2]] (%p716_p9), %s640_s7  ;;  %s641_s22 = smov 128  }
  0xbb   : > { %502 = sst [smem:[#allocation9 + $0x3]] (%p716_p9), %s641_s22  ;;  %s642_s15 = smov 8  }
  0xbc   : > { %503 = sst [smem:[#allocation9 + $0x4]] (%p716_p9), %s641_s22  ;;  %s643_s28 = smov 131072  }
  0xbd   : > { %504 = sst [smem:[#allocation9 + $0x5]] (%p716_p9), %s642_s15  ;;  %s644_s6 = smov 0  }
  0xbe   : > { %505 = dma.general (%p716_p9), %s345_s30, 512, %s333_s10, %s316_s23, %s643_s28, [#allocation9], %s644_s6, 0  }
  0xbf PF: > { %p511_p3 = scmp.ge.s32.totalorder %s629_s17, 2  ;;  %s372_s9 = sand.u32 1, %s609_s12  }
  0xc0   : > { %s373_s18 = scalar_lea.sflag [#allocation4], %s372_s9 }
  0xc1   : > { %p508_p4 = pnand %p511_p3, %p723_p11 }
  0xc3   : > { %p509_p5 = pneg %p508_p4 }
  0xc5   : > { %604 = dma.done.wait (%p509_p5), %s373_s18, 512  }
  0xc6   : > { %606 = vsyncadd (%p509_p5), %s373_s18, 4294966784  ;;  %s19_s17 = sadd.s32 1, %s629_s17   ;;  %s817_s12 = smov %s613_s13 }
  0xc7   : > { %p16_p6 = scmp.ge.s32.totalorder %s19_s17, 6   ;;  %s818_s13 = smov %s617_s14 }
  0xc8   : > { %s819_s14 = smov %s721_s26  ;;  %s820_s15 = smov %s625_s16 }
  0xc9   : > { %s821_s16 = smov %s823_s20  ;;  %18 = sbr.rel (!%p16_p6) target bundleno = 6 (0x6), region = 93 }
  0xce   :  { %378 = vsyncpa [#allocation3], 1 }
  0xcf   :  { %380 = vsyncpa [#allocation3 + $0x1], 1 }
  0xd0   :  { %381 = vsyncpa [#allocation4], 1 }
  0xd1   :  { %383 = vsyncpa [#allocation4 + $0x1], 1 }

</bundles_post_ra>
